<compile_context>
chip_gen: v6e
topology: v6e:2x2x1
jax: 0.10.0
libtpu: 0.0.40
codegen_flags: <defaults>
</compile_context>

<pallas_src>
import functools

import jax
import jax.numpy as jnp
from jax.experimental import pallas as pl
from jax.experimental.pallas import tpu as pltpu

INPUT_DIM = 32
HIDDEN_DIM = 64
IMG_DIM = 33                      # image_head: rgb(3) + other(29) + sigma(1)
MASK_DIM = 19                     # mask_head (softmaxed -> label)
OUT_DIM = IMG_DIM + MASK_DIM      # 52 = [rgb, other, sigma, label]


def _stylemlp_mask_kernel(x_ref, w1_ref, b1_ref, wh_ref, bh_ref, o_ref):
    # x_ref: (tm, 32); w1: (32, 64); wh: (64, 52); biases f32 (1, dim).
    w1 = w1_ref[...]
    x = x_ref[...].astype(w1.dtype)            # bf16 MXU operands if enabled

    # base_network: FC(32 -> 64) + Softplus (f32 accumulation / activations)
    h = jnp.dot(x, w1, preferred_element_type=jnp.float32) + b1_ref[...]
    h = jax.nn.softplus(h)

    # fused heads: one FC(64 -> 52) = [image_head(33) | mask_head(19)]
    wh = wh_ref[...]
    y = jnp.dot(h.astype(wh.dtype), wh,
                preferred_element_type=jnp.float32) + bh_ref[...]

    # Per-column activation via a lane mask (no lane slicing, single store):
    #   cols 0..2   -> sigmoid(y) * (1 + 2*0.001) - 0.001     (rgb)
    #   cols 3..31  -> identity                               (other)
    #   col  32     -> softplus(y)                            (sigma)
    #   cols 33..51 -> softmax over these 19 columns          (label)
    col = jax.lax.broadcasted_iota(jnp.int32, y.shape, 1)
    is_label = col >= IMG_DIM

    # One shared exp(-|y|) feeds both sigmoid and softplus (numerically stable,
    # one fewer full-width EUP pass than calling jax.nn.sigmoid + softplus).
    e_na = jnp.exp(-jnp.abs(y))
    inv_1p = 1.0 / (1.0 + e_na)
    sigmoid_y = jnp.where(y >= 0.0, inv_1p, e_na * inv_1p)
    softplus_y = jnp.maximum(y, 0.0) + jnp.log1p(e_na)

    rgb_act = sigmoid_y * (1.0 + 2.0 * 0.001) - 0.001
    img_act = jnp.where(col < 3, rgb_act,
                        jnp.where(col == IMG_DIM - 1, softplus_y, y))

    # Masked softmax over the label columns.  NOTE: keep the additive mask +
    # post-where; multiplicative masking would turn inf*0 into NaN.
    neg_big = jnp.float32(-1e30)
    m = jnp.max(jnp.where(is_label, y, neg_big), axis=-1, keepdims=True)
    e = jnp.where(is_label, jnp.exp(y - m), 0.0)
    denom = jnp.sum(e, axis=-1, keepdims=True)
    label = e / denom                 # exact divide: probabilities sum to 1

    # single full-width store: [img_act(33) | label(19)]
    o_ref[...] = jnp.where(is_label, label, img_act).astype(o_ref.dtype)


def init_params(key, matmul_dtype=jnp.bfloat16):
    """Deterministic params matching the module's shapes.

    torch weights are (out, in) ~ N(0,1); the StyleGAN FC applies
    weight_gain = 1/sqrt(in) at forward time and bias_init=1.  We pre-scale,
    transpose to (in, out), and fuse the two head weights into one (64, 52)
    block so the kernel is two plain addmms.
    """
    k1, k2, k3 = jax.random.split(key, 3)

    def fc(k, in_f, out_f):
        w = jax.random.normal(k, (out_f, in_f), jnp.float32)
        w = (w * (1.0 / jnp.sqrt(jnp.float32(in_f)))).T       # (in, out)
        b = jnp.ones((1, out_f), jnp.float32)                 # bias_init=1
        return w, b

    w1, b1 = fc(k1, INPUT_DIM, HIDDEN_DIM)
    wi, bi = fc(k2, HIDDEN_DIM, IMG_DIM)
    wm, bm = fc(k3, HIDDEN_DIM, MASK_DIM)
    w_head = jnp.concatenate([wi, wm], axis=1)                 # (64, 52)
    b_head = jnp.concatenate([bi, bm], axis=1)                 # (1, 52)
    return dict(w1=w1.astype(matmul_dtype), b1=b1,
                w_head=w_head.astype(matmul_dtype), b_head=b_head)


def _choose_tm(M, tm_max):
    """Row tile: multiple of 8, capped at tm_max, never larger than needed."""
    tm = min(int(tm_max), ((M + 7) // 8) * 8)
    return max(8, (tm // 8) * 8)


@functools.partial(jax.jit, static_argnames=("tm",))
def _run_pallas(xf, w1, b1, w_head, b_head, *, tm):
    M = xf.shape[0]
    grid = (pl.cdiv(M, tm),)        # ragged final block clipped by Pallas
    return pl.pallas_call(
        _stylemlp_mask_kernel,
        out_shape=jax.ShapeDtypeStruct((M, OUT_DIM), xf.dtype),
        grid_spec=pltpu.PrefetchScalarGridSpec(
            num_scalar_prefetch=0,
            grid=grid,
            in_specs=[
                pl.BlockSpec((tm, INPUT_DIM), lambda i: (i, 0)),
                pl.BlockSpec((INPUT_DIM, HIDDEN_DIM), lambda i: (0, 0)),
                pl.BlockSpec((1, HIDDEN_DIM), lambda i: (0, 0)),
                pl.BlockSpec((HIDDEN_DIM, OUT_DIM), lambda i: (0, 0)),
                pl.BlockSpec((1, OUT_DIM), lambda i: (0, 0)),
            ],
            out_specs=pl.BlockSpec((tm, OUT_DIM), lambda i: (i, 0)),
        ),
        compiler_params=pltpu.CompilerParams(
            dimension_semantics=("parallel",),
            vmem_limit_bytes=32 * 1024 * 1024),
    )(xf, w1, b1, w_head, b_head)


def stylemlp_mask_forward(x, params, tm_max=2048):
    """x: (batch, n_points, 32) -> (batch, n_points, 52), dtype follows x.

    No pad copy: all kernel math is per-row, so the ragged final grid block is
    handled by Pallas clipping (garbage rows never affect valid rows and their
    writes are masked).
    """
    B, N, D = x.shape
    assert D == INPUT_DIM
    M = B * N
    xf = x.reshape(M, D)
    tm = _choose_tm(M, tm_max)
    out = _run_pallas(xf, params["w1"], params["b1"],
                      params["w_head"], params["b_head"], tm=tm)
    return out.reshape(B, N, OUT_DIM)


def stylemlp_mask_reference(x, params):
    """Pure-JAX reference of the PyTorch forward (f32 math)."""
    B, N, D = x.shape
    xf = x.reshape(-1, D).astype(jnp.float32)
    w1 = params["w1"].astype(jnp.float32)
    wh = params["w_head"].astype(jnp.float32)
    h = jax.nn.softplus(xf @ w1 + params["b1"])
    head = h @ wh + params["b_head"]
    img = head[:, :IMG_DIM].reshape(B, N, IMG_DIM)
    msk = head[:, IMG_DIM:].reshape(B, N, MASK_DIM)
    rgb = jax.nn.sigmoid(img[:, :, :3]) * (1 + 2 * 0.001) - 0.001
    other = img[:, :, 3:32]
    sigma = jax.nn.softplus(img[:, :, 32:33])
    label = jax.nn.softmax(msk, axis=-1)
    return jnp.concatenate([rgb, other, sigma, label], axis=-1)


if __name__ == "__main__":
    key = jax.random.PRNGKey(0)
    kp, kx, kr = jax.random.split(key, 3)

    # small shapes consistent with the module: batch=2, n_points=8, dim=32
    x = jax.random.normal(kx, (2, 8, INPUT_DIM), jnp.float32)

    # 1) f32 matmul path: tight check of kernel math vs. module semantics.
    params_f32 = init_params(kp, matmul_dtype=jnp.float32)
    out_f32 = jax.block_until_ready(stylemlp_mask_forward(x, params_f32))
    ref_f32 = stylemlp_mask_reference(x, params_f32)
    assert out_f32.shape == (2, 8, OUT_DIM)
    assert jnp.allclose(out_f32, ref_f32, atol=5e-3, rtol=5e-3), (
        "f32 path max abs err = "
        + str(float(jnp.max(jnp.abs(out_f32 - ref_f32)))))

    # 2) bf16 matmul operands (v6e/v7x recommendation): looser tolerance,
    #    activations / accumulation / IO stay f32.
    params_bf16 = init_params(kp, matmul_dtype=jnp.bfloat16)
    out_bf16 = jax.block_until_ready(stylemlp_mask_forward(x, params_bf16))
    ref_bf16 = stylemlp_mask_reference(x, params_bf16)
    assert jnp.allclose(out_bf16, ref_bf16, atol=3e-2, rtol=3e-2), (
        "bf16 path max abs err = "
        + str(float(jnp.max(jnp.abs(out_bf16 - ref_bf16)))))

    # 3) ragged-grid path (no pad copy): M=200 with tm=64 -> 4 steps, last
    #    block only 8 valid rows.  Exercises Pallas block clipping.
    x2 = jax.random.normal(kr, (2, 100, INPUT_DIM), jnp.float32)
    out_r = jax.block_until_ready(
        stylemlp_mask_forward(x2, params_f32, tm_max=64))
    ref_r = stylemlp_mask_reference(x2, params_f32)
    assert out_r.shape == (2, 100, OUT_DIM)
    assert jnp.allclose(out_r, ref_r, atol=5e-3, rtol=5e-3), (
        "ragged path max abs err = "
        + str(float(jnp.max(jnp.abs(out_r - ref_r)))))

    print("KERNEL_OK")
</pallas_src>

<mosaic_0001>
module attributes {stable_mosaic.version = 11 : i64} {
  func.func @_stylemlp_mask_kernel(%arg0: i32, %arg1: memref<16x32xf32, #tpu.memory_space<vmem>>, %arg2: memref<32x64xf32, #tpu.memory_space<vmem>>, %arg3: memref<1x64xf32, #tpu.memory_space<vmem>>, %arg4: memref<64x52xf32, #tpu.memory_space<vmem>>, %arg5: memref<1x52xf32, #tpu.memory_space<vmem>>, %arg6: memref<16x52xf32, #tpu.memory_space<vmem>>) attributes {dimension_semantics = [#tpu.dimension_semantics<parallel>], iteration_bounds = array<i64: 1>, scalar_prefetch = 0 : i64, scratch_operands = 0 : i64, tpu.core_type = #tpu.core_type<tc>, window_params = [{transform_indices = @transform_0, window_bounds = array<i64: 16, 32>}, {pipeline_mode = #tpu.pipeline_mode<synchronous>, transform_indices = @transform_1, window_bounds = array<i64: 32, 64>}, {pipeline_mode = #tpu.pipeline_mode<synchronous>, transform_indices = @transform_2, window_bounds = array<i64: 1, 64>}, {pipeline_mode = #tpu.pipeline_mode<synchronous>, transform_indices = @transform_3, window_bounds = array<i64: 64, 52>}, {pipeline_mode = #tpu.pipeline_mode<synchronous>, transform_indices = @transform_4, window_bounds = array<i64: 1, 52>}, {transform_indices = @transform_5, window_bounds = array<i64: 16, 52>}]} {
    %c0 = arith.constant 0 : index
    %c0_0 = arith.constant 0 : index
    %0 = vector.load %arg2[%c0, %c0_0] : memref<32x64xf32, #tpu.memory_space<vmem>>, vector<32x64xf32>
    %c0_1 = arith.constant 0 : index
    %c0_2 = arith.constant 0 : index
    %1 = vector.load %arg1[%c0_1, %c0_2] : memref<16x32xf32, #tpu.memory_space<vmem>>, vector<16x32xf32>
    %cst = arith.constant dense<0.000000e+00> : vector<16x64xf32>
    %2 = tpu.matmul %1, %0, %cst {dimension_numbers = #tpu.dot_dimension_numbers<[1], [0], [0], [1], [0, 0, 1, 1], [], []>} : vector<16x32xf32>, vector<32x64xf32>, vector<16x64xf32> -> vector<16x64xf32>
    %c0_3 = arith.constant 0 : index
    %c0_4 = arith.constant 0 : index
    %3 = vector.load %arg3[%c0_3, %c0_4] : memref<1x64xf32, #tpu.memory_space<vmem>>, vector<1x64xf32>
    %4 = vector.broadcast %3 : vector<1x64xf32> to vector<16x64xf32>
    %5 = arith.addf %2, %4 : vector<16x64xf32>
    %cst_5 = arith.constant 0.000000e+00 : f32
    %6 = vector.broadcast %cst_5 : f32 to vector<16x64xf32>
    %7 = arith.maximumf %5, %6 : vector<16x64xf32>
    %8 = vector.broadcast %cst_5 : f32 to vector<16x64xf32>
    %9 = arith.subf %5, %8 : vector<16x64xf32>
    %10 = arith.cmpf one, %9, %9 : vector<16x64xf32>
    %11 = vector.broadcast %cst_5 : f32 to vector<16x64xf32>
    %12 = arith.addf %5, %11 : vector<16x64xf32>
    %13 = math.absf %9 : vector<16x64xf32>
    %cst_6 = arith.constant 0.000000e+00 : f32
    %14 = vector.broadcast %cst_6 : f32 to vector<16x64xf32>
    %15 = arith.subf %14, %13 : vector<16x64xf32>
    %16 = math.exp %15 : vector<16x64xf32>
    %17 = math.log1p %16 : vector<16x64xf32>
    %18 = arith.addf %7, %17 : vector<16x64xf32>
    %19 = arith.select %10, %12, %18 : vector<16x64xi1>, vector<16x64xf32>
    %c0_7 = arith.constant 0 : index
    %c0_8 = arith.constant 0 : index
    %20 = vector.load %arg4[%c0_7, %c0_8] : memref<64x52xf32, #tpu.memory_space<vmem>>, vector<64x52xf32>
    %cst_9 = arith.constant dense<0.000000e+00> : vector<16x52xf32>
    %21 = tpu.matmul %19, %20, %cst_9 {dimension_numbers = #tpu.dot_dimension_numbers<[1], [0], [0], [1], [0, 0, 1, 1], [], []>} : vector<16x64xf32>, vector<64x52xf32>, vector<16x52xf32> -> vector<16x52xf32>
    %c0_10 = arith.constant 0 : index
    %c0_11 = arith.constant 0 : index
    %22 = vector.load %arg5[%c0_10, %c0_11] : memref<1x52xf32, #tpu.memory_space<vmem>>, vector<1x52xf32>
    %23 = vector.broadcast %22 : vector<1x52xf32> to vector<16x52xf32>
    %24 = arith.addf %21, %23 : vector<16x52xf32>
    %25 = tpu.iota {dimensions = array<i32: 1>} : vector<16x52xi32>
    %c33_i32 = arith.constant 33 : i32
    %26 = vector.broadcast %c33_i32 : i32 to vector<16x52xi32>
    %27 = arith.cmpi sge, %25, %26 : vector<16x52xi32>
    %28 = math.absf %24 : vector<16x52xf32>
    %cst_12 = arith.constant 0.000000e+00 : f32
    %29 = vector.broadcast %cst_12 : f32 to vector<16x52xf32>
    %30 = arith.subf %29, %28 : vector<16x52xf32>
    %31 = math.exp %30 : vector<16x52xf32>
    %cst_13 = arith.constant 1.000000e+00 : f32
    %32 = vector.broadcast %cst_13 : f32 to vector<16x52xf32>
    %33 = arith.addf %32, %31 : vector<16x52xf32>
    %cst_14 = arith.constant 1.000000e+00 : f32
    %34 = vector.broadcast %cst_14 : f32 to vector<16x52xf32>
    %35 = arith.divf %34, %33 : vector<16x52xf32>
    %cst_15 = arith.constant 0.000000e+00 : f32
    %36 = vector.broadcast %cst_15 : f32 to vector<16x52xf32>
    %37 = arith.cmpf oge, %24, %36 : vector<16x52xf32>
    %38 = arith.mulf %31, %35 : vector<16x52xf32>
    %39 = arith.select %37, %35, %38 : vector<16x52xi1>, vector<16x52xf32>
    %cst_16 = arith.constant 0.000000e+00 : f32
    %40 = vector.broadcast %cst_16 : f32 to vector<16x52xf32>
    %41 = arith.maximumf %24, %40 : vector<16x52xf32>
    %42 = math.log1p %31 : vector<16x52xf32>
    %43 = arith.addf %41, %42 : vector<16x52xf32>
    %cst_17 = arith.constant 1.002000e+00 : f32
    %44 = vector.broadcast %cst_17 : f32 to vector<16x52xf32>
    %45 = arith.mulf %39, %44 : vector<16x52xf32>
    %cst_18 = arith.constant 1.000000e-03 : f32
    %46 = vector.broadcast %cst_18 : f32 to vector<16x52xf32>
    %47 = arith.subf %45, %46 : vector<16x52xf32>
    %c3_i32 = arith.constant 3 : i32
    %48 = vector.broadcast %c3_i32 : i32 to vector<16x52xi32>
    %49 = arith.cmpi slt, %25, %48 : vector<16x52xi32>
    %c32_i32 = arith.constant 32 : i32
    %50 = vector.broadcast %c32_i32 : i32 to vector<16x52xi32>
    %51 = arith.cmpi eq, %25, %50 : vector<16x52xi32>
    %52 = arith.select %51, %43, %24 : vector<16x52xi1>, vector<16x52xf32>
    %53 = arith.select %49, %47, %52 : vector<16x52xi1>, vector<16x52xf32>
    %cst_19 = arith.constant -1.000000e+30 : f32
    %54 = vector.broadcast %cst_19 : f32 to vector<16x52xf32>
    %55 = arith.select %27, %24, %54 : vector<16x52xi1>, vector<16x52xf32>
    %cst_20 = arith.constant dense<0xFF800000> : vector<16xf32>
    %56 = vector.multi_reduction <maximumf>, %55, %cst_20 [1] : vector<16x52xf32> to vector<16xf32>
    %57 = vector.shape_cast %56 : vector<16xf32> to vector<16x1xf32>
    %58 = vector.broadcast %57 : vector<16x1xf32> to vector<16x52xf32>
    %59 = arith.subf %24, %58 : vector<16x52xf32>
    %60 = math.exp %59 : vector<16x52xf32>
    %cst_21 = arith.constant 0.000000e+00 : f32
    %61 = vector.broadcast %cst_21 : f32 to vector<16x52xf32>
    %62 = arith.select %27, %60, %61 : vector<16x52xi1>, vector<16x52xf32>
    %cst_22 = arith.constant dense<0.000000e+00> : vector<16xf32>
    %63 = vector.multi_reduction <add>, %62, %cst_22 [1] : vector<16x52xf32> to vector<16xf32>
    %64 = vector.shape_cast %63 : vector<16xf32> to vector<16x1xf32>
    %65 = vector.broadcast %64 : vector<16x1xf32> to vector<16x52xf32>
    %66 = arith.divf %62, %65 : vector<16x52xf32>
    %67 = arith.select %27, %66, %53 : vector<16x52xi1>, vector<16x52xf32>
    %c0_23 = arith.constant 0 : index
    %c0_24 = arith.constant 0 : index
    %68 = vector.load %arg6[%c0_23, %c0_24] : memref<16x52xf32, #tpu.memory_space<vmem>>, vector<16x52xf32>
    tpu.vector_store %arg6[%c0_23, %c0_24], %67 {strides = array<i32>} : memref<16x52xf32, #tpu.memory_space<vmem>>, vector<16x52xf32>,
    return
  }
  func.func @transform_0(%arg0: i32) -> (i32, i32) {
    %c0_i32 = arith.constant 0 : i32
    %c0_i32_0 = arith.constant 0 : i32
    return %arg0, %c0_i32 : i32, i32
  }
  func.func @transform_1(%arg0: i32) -> (i32, i32) {
    %c0_i32 = arith.constant 0 : i32
    %c0_i32_0 = arith.constant 0 : i32
    %c0_i32_1 = arith.constant 0 : i32
    return %c0_i32, %c0_i32_0 : i32, i32
  }
  func.func @transform_2(%arg0: i32) -> (i32, i32) {
    %c0_i32 = arith.constant 0 : i32
    %c0_i32_0 = arith.constant 0 : i32
    %c0_i32_1 = arith.constant 0 : i32
    return %c0_i32, %c0_i32_0 : i32, i32
  }
  func.func @transform_3(%arg0: i32) -> (i32, i32) {
    %c0_i32 = arith.constant 0 : i32
    %c0_i32_0 = arith.constant 0 : i32
    %c0_i32_1 = arith.constant 0 : i32
    return %c0_i32, %c0_i32_0 : i32, i32
  }
  func.func @transform_4(%arg0: i32) -> (i32, i32) {
    %c0_i32 = arith.constant 0 : i32
    %c0_i32_0 = arith.constant 0 : i32
    %c0_i32_1 = arith.constant 0 : i32
    return %c0_i32, %c0_i32_0 : i32, i32
  }
  func.func @transform_5(%arg0: i32) -> (i32, i32) {
    %c0_i32 = arith.constant 0 : i32
    %c0_i32_0 = arith.constant 0 : i32
    return %arg0, %c0_i32 : i32, i32
  }
}

</mosaic_0001>

<bundles_post_ra>
// kernel: _run_pallas.1
= control target key start
LH: loop header
LB: loop body
LE: loop exit
PB: predicated region body
PF: predicated region fallthrough
CT: control target
= control target key end

     0   :  { %vm34_vm0 = vcmask 261120   ;;  %s585_s0 = inlined_call_operand.vmem [shape: f32[16,32], index: 0, kind: input, shape index: {}]   ;;  %s586_s1 = inlined_call_operand.vmem [shape: f32[32,64], index: 1, kind: input, shape index: {}]   ;;  %s587_s2 = inlined_call_operand.vmem [shape: f32[1,64], index: 2, kind: input, shape index: {}]   ;;  %s588_s3 = inlined_call_operand.vmem [shape: f32[64,52], index: 3, kind: input, shape index: {}]   ;;  %s589_s4 = inlined_call_operand.vmem [shape: f32[1,52], index: 4, kind: input, shape index: {}]   ;;  %s590_s5 = inlined_call_operand.hbm [shape: f32[16,52], index: 5, kind: output, shape index: {}]  }
   0x1   :  { %v24_v0 = vld [vmem:[%s586_s1 + $0x18] sm:$0xff]  ;;  %v23_v1 = vld [vmem:[%s586_s1 + $0x10] sm:$0xff]  ;;  %v25_v2 = vld [vmem:[%s585_s0] sm:$0xff] }
   0x2   :  { %375 = vmatprep.subr.mxu0 %v24_v0  ;;  %v22_v3 = vld [vmem:[%s586_s1 + $0x8] sm:$0xff]  ;;  %383 = vmatprep.mubr.msk.f32.mxu0 %vm34_vm0, %v25_v2 }
   0x3   :  { %376 = vmatpush3.msra.mxu0 %v24_v0 }
   0x4   :  { %10 = vsyncpa [#allocation3], 0  ;;  %377 = vmatprep.subr.mxu0 %v23_v1  ;;  %v21_v4 = vld [vmem:[%s586_s1] sm:$0xff]  ;;  %v26_v5 = vld [vmem:[%s585_s0 + $0x8] sm:$0xff]  ;;  %vm167_vm3 = vcmask 523264   ;;  %v249_v49 = vlaneseq  ;;  %vm306_vm7 = vcmask 424960  }
   0x5   :  { %378 = vmatpush3.msra.mxu0 %v23_v1  ;;  %v159_v6 = vld [vmem:[%s588_s3 + $0x38] sm:$0xff]  ;;  %v158_v7 = vld [vmem:[%s588_s3 + $0x30] sm:$0xff]  ;;  %v157_v8 = vld [vmem:[%s588_s3 + $0x28] sm:$0xff] }
   0x6   :  { %379 = vmatprep.subr.mxu0 %v22_v3  ;;  %386 = vmatprep.subr.mxu1 %v159_v6  ;;  %v156_v9 = vld [vmem:[%s588_s3 + $0x20] sm:$0xff]  ;;  %v155_v10 = vld [vmem:[%s588_s3 + $0x18] sm:$0xff]  ;;  %v154_v11 = vld [vmem:[%s588_s3 + $0x10] sm:$0xff]  ;;  %v539_v52 = vand.u32 127, %v249_v49 }
   0x7   :  { %380 = vmatpush3.msra.mxu0 %v22_v3  ;;  %387 = vmatpush3.msra.mxu1 %v159_v6  ;;  %v153_v12 = vld [vmem:[%s588_s3 + $0x8] sm:$0xff]  ;;  %v152_v13 = vld [vmem:[%s588_s3] sm:$0xff] }
   0x8   :  { %381 = vmatprep.subr.mxu0 %v21_v4  ;;  %388 = vmatprep.subr.mxu1 %v158_v7  ;;  %v351_v14 = vld [vmem:[%s587_s2] ss:$0 sm:$0xff]  ;;  %vm251_vm6 = vcmp.ge.s32.totalorder %v539_v52, 33  ;;  %vm299_vm12 = vcmp.eq.s32.totalorder %v539_v52, 32  ;;  %vm298_vm13 = vcmp.lt.s32.totalorder %v539_v52, 3 }
   0x9   :  { %382 = vmatpush3.msra.mxu0 %v21_v4  ;;  %389 = vmatpush3.msra.mxu1 %v158_v7  ;;  %v354_v51 = vld [vmem:[%s589_s4] ss:$0 sm:$0xff]  ;;  %s458_s4 = smov [#allocation2]  }
   0xa   :  { %384 = vmatmul.mubr.msk.f32.vlgmr.msra.gmra.mxu0 %vm34_vm0, %v26_v5  ;;  %390 = vmatprep.subr.mxu1 %v157_v8  ;;  %s340_s21 = sshll.u32 %s458_s4, 4  ;;  %s341_s21 = int_to_ptr.vmem [resolvable:$true] %s340_s21 }
   0xb   :  { %391 = vmatpush3.msra.mxu1 %v157_v8  ;;  %s436_s22 = scalar_lea.vmem %s341_s21, 256  ;;  %p441_p1 = scmp.lt.s32.totalorder %s341_s21, %s341_s21 }
   0xc   :  { %392 = vmatprep.subr.mxu1 %v156_v9  ;;  %p437_p0 = scmp.ne.s32.totalorder %s341_s21, %s436_s22  ;;  %p442_p2 = scmp.lt.s32.totalorder %s436_s22, %s436_s22 }
   0xd   :  { %393 = vmatpush3.msra.mxu1 %v156_v9 }
   0xe   :  { %394 = vmatprep.subr.mxu1 %v155_v10  ;;  %p443_p3 = por %p442_p2, %p441_p1 }
   0xf   :  { %395 = vmatpush3.msra.mxu1 %v155_v10 }
  0x10   :  { %396 = vmatprep.subr.mxu1 %v154_v11  ;;  %p444_p4 = pnand %p443_p3, %p437_p0 }
  0x11   :  { %397 = vmatpush3.msra.mxu1 %v154_v11 }
  0x12   :  { %398 = vmatprep.subr.mxu1 %v153_v12 }
  0x13   :  { %399 = vmatpush3.msra.mxu1 %v153_v12 }
  0x14   :  { %400 = vmatprep.subr.mxu1 %v152_v13 }
  0x15   :  { %401 = vmatpush3.msra.mxu1 %v152_v13 }
  0xca   :  { %v385_v15 = vpop.f32.mrf.mxu0 }
  0xcb   :  { %v113_v16 = vadd.f32 %v385_v15, %v351_v14 }
  0xcc   :  { %v107_v17 = vpop.f32.mrf.mxu0 }
  0xcd   :  { %v123_v18 = vand.u32 2147483647, %v113_v16  ;;  %v108_v19 = vadd.f32 %v351_v14, %v107_v17  ;;  %v117_v39 = vmax.f32 %v113_v16, 0.0  ;;  %vm119_vm5 = vcmp.ne.f32.partialorder %v113_v16, %v113_v16 }
  0xcf   :  { %v125_v20 = vsub.f32 0.0, %v123_v18  ;;  %v122_v21 = vand.u32 2147483647, %v108_v19  ;;  %v116_v43 = vmax.f32 %v108_v19, 0.0  ;;  %vm118_vm4 = vcmp.ne.f32.partialorder %v108_v19, %v108_v19 }
  0xd1   :  { %v128_v22 = vmul.f32 1.442695, %v125_v20  ;;  %v124_v23 = vsub.f32 0.0, %v122_v21 }
  0xd3   :  { %408 = vpow2.f32 %v128_v22  ;;  %v126_v24 = vmul.f32 1.442695, %v124_v23 }
  0xd5   :  { %410 = vpow2.f32 %v126_v24 }
  0xe0   :  { %v409_v25 = vpop.eup %408 }
  0xe1   :  { %v139_v26 = vadd.f32 1.0, %v409_v25  ;;  %v142_v29 = vmul.f32 -0.5, %v409_v25  ;;  %v145_v32 = vand.u32 2147483647, %v409_v25 }
  0xe2   :  { %v411_v27 = vpop.eup %410 }
  0xe3   :  { %v130_v28 = vadd.f32 1.0, %v411_v27  ;;  %412 = vlog2.f32 %v139_v26  ;;  %v133_v30 = vmul.f32 -0.5, %v411_v27  ;;  %v143_v31 = vadd.f32 1.0, %v142_v29 }
  0xe4   :  { %v136_v35 = vand.u32 2147483647, %v411_v27  ;;  %vm146_vm1 = vcmp.lt.f32.partialorder %v145_v32, 0.0004427343 }
  0xe5   :  { %414 = vlog2.f32 %v130_v28  ;;  %v134_v33 = vadd.f32 1.0, %v133_v30  ;;  %v144_v37 = vmul.f32 %v409_v25, %v143_v31 }
  0xe6   :  { %vm137_vm2 = vcmp.lt.f32.partialorder %v136_v35, 0.0004427343 }
  0xe7   :  { %v135_v41 = vmul.f32 %v411_v27, %v134_v33 }
  0xf0   :  { %v413_v34 = vpop.eup %412 }
  0xf1   :  { %v141_v36 = vmul.f32 0.6931472, %v413_v34 }
  0xf2   :  { %v415_v38 = vpop.eup %414 }
  0xf3   :  { %v132_v40 = vmul.f32 0.6931472, %v415_v38  ;;  %v147_v42 = vsel %vm146_vm1, %v144_v37, %v141_v36 }
  0xf4   :  { %v149_v45 = vadd.f32 %v147_v42, %v117_v39 }
  0xf5   :  { %v138_v44 = vsel %vm137_vm2, %v135_v41, %v132_v40 }
  0xf6   :  { %v148_v46 = vadd.f32 %v138_v44, %v116_v43  ;;  %v151_v48 = vsel %vm119_vm5, %v113_v16, %v149_v45 }
  0xf8   :  { %v150_v47 = vsel %vm118_vm4, %v108_v19, %v148_v46 }
  0xf9   :  { %402 = vmatprep.mubr.msk.f32.mxu1 %vm167_vm3, %v150_v47 }
  0xfa   :  { %403 = vmatmul.mubr.msk.f32.vlgmr.msra.gmra.mxu1 %vm167_vm3, %v151_v48 }
 0x1ba   :  { %v404_v50 = vpop.f32.mrf.mxu1 }
 0x1bb   :  { %v543_v55 = vadd.f32 %v404_v50, %v354_v51 }
 0x1bc   :  { %v240_v53 = vpop.f32.mrf.mxu1 }
 0x1bd   :  { %v541_v54 = vadd.f32 %v354_v51, %v240_v53  ;;  %v305_v58 = vsel %vm251_vm6, %v543_v55, -1e+30  ;;  %v253_v9 = vand.u32 2147483647, %v543_v55  ;;  %vm267_vm10 = vcmp.ge.f32.partialorder %v543_v55, 0.0 }
 0x1be   :  { %v310_v59 = vsel %vm306_vm7, %v305_v58, -inf  ;;  %v273_v43 = vmax.f32 %v543_v55, 0.0 }
 0x1bf   :  { %v304_v56 = vsel %vm251_vm6, %v541_v54, -1e+30  ;;  %v252_v8 = vand.u32 2147483647, %v541_v54  ;;  %v255_v11 = vsub.f32 0.0, %v253_v9  ;;  %vm266_vm8 = vcmp.ge.f32.partialorder %v541_v54, 0.0 }
 0x1c0   :  { %v307_v57 = vsel %vm306_vm7, %v304_v56, -inf  ;;  %v272_v37 = vmax.f32 %v541_v54, 0.0 }
 0x1c1   :  { %308 = vmax.xlane.f32.xlu0 %v307_v57  ;;  %v254_v10 = vsub.f32 0.0, %v252_v8  ;;  %v258_v13 = vmul.f32 1.442695, %v255_v11 }
 0x1c3   :  { %v256_v12 = vmul.f32 1.442695, %v254_v10 }
 0x1c5   :  { %311 = vmax.xlane.f32.xlu0 %v310_v59 }
 0x24a   :  { %v309_v60 = vpop.xlane.xlu0 %308 }
 0x24b   :  { %v313_v61 = vsub.f32 %v541_v54, %v309_v60 }
 0x24d   :  { %v315_v62 = vmul.f32 1.442695, %v313_v61 }
 0x24e   :  { %v312_v63 = vpop.xlane.xlu0 %311 }
 0x24f   :  { %416 = vpow2.f32 %v315_v62  ;;  %v314_v0 = vsub.f32 %v543_v55, %v312_v63 }
 0x251   :  { %v317_v1 = vmul.f32 1.442695, %v314_v0 }
 0x253   :  { %418 = vpow2.f32 %v317_v1 }
 0x254   :  { %420 = vpow2.f32 %v256_v12 }
 0x255   :  { %422 = vpow2.f32 %v258_v13 }
 0x25c   :  { %v417_v2 = vpop.eup %416 }
 0x25d   :  { %v319_v3 = vsel %vm251_vm6, %v417_v2, 0.0 }
 0x25e   :  { %v321_v4 = vsel %vm306_vm7, %v319_v3, 0.0 }
 0x25f   :  { %322 = vadd.xlane.f32.xlu1 %v321_v4 }
 0x260   :  { %v419_v5 = vpop.eup %418 }
 0x261   :  { %v561_v6 = vsel %vm251_vm6, %v419_v5, 0.0  ;;  %v421_v14 = vpop.eup %420 }
 0x262   :  { %v324_v7 = vsel %vm306_vm7, %v561_v6, 0.0  ;;  %v260_v15 = vadd.f32 1.0, %v421_v14  ;;  %v423_v16 = vpop.eup %422  ;;  %v277_v18 = vmul.f32 -0.5, %v421_v14  ;;  %v280_v25 = vand.u32 2147483647, %v421_v14 }
 0x263   :  { %325 = vadd.xlane.f32.xlu1 %v324_v7  ;;  %v261_v17 = vadd.f32 1.0, %v423_v16  ;;  %v286_v23 = vmul.f32 -0.5, %v423_v16  ;;  %v289_v32 = vand.u32 2147483647, %v423_v16 }
 0x264   :  { %424 = vrcp.f32 %v260_v15  ;;  %v278_v22 = vadd.f32 1.0, %v277_v18  ;;  %vm281_vm9 = vcmp.lt.f32.partialorder %v280_v25, 0.0004427343 }
 0x265   :  { %426 = vlog2.f32 %v260_v15  ;;  %v287_v31 = vadd.f32 1.0, %v286_v23  ;;  %vm290_vm11 = vcmp.lt.f32.partialorder %v289_v32, 0.0004427343 }
 0x266   :  { %428 = vrcp.f32 %v261_v17  ;;  %v279_v30 = vmul.f32 %v421_v14, %v278_v22 }
 0x267   :  { %430 = vlog2.f32 %v261_v17  ;;  %v288_v38 = vmul.f32 %v423_v16, %v287_v31 }
 0x271   :  { %v425_v19 = vpop.eup %424 }
 0x272   :  { %v427_v20 = vpop.eup %426  ;;  %v268_v24 = vmul.f32 %v425_v19, %v421_v14 }
 0x273   :  { %v429_v26 = vpop.eup %428  ;;  %v276_v27 = vmul.f32 0.6931472, %v427_v20 }
 0x274   :  { %v431_v28 = vpop.eup %430  ;;  %v269_v33 = vmul.f32 %v429_v26, %v423_v16  ;;  %v270_v34 = vsel %vm266_vm8, %v425_v19, %v268_v24 }
 0x275   :  { %v282_v35 = vsel %vm281_vm9, %v279_v30, %v276_v27  ;;  %v285_v36 = vmul.f32 0.6931472, %v431_v28  ;;  %v294_v39 = vmul.f32 1.002, %v270_v34 }
 0x276   :  { %v271_v40 = vsel %vm267_vm10, %v429_v26, %v269_v33  ;;  %v292_v41 = vadd.f32 %v282_v35, %v272_v37 }
 0x277   :  { %v291_v42 = vsel %vm290_vm11, %v288_v38, %v285_v36  ;;  %v295_v44 = vmul.f32 1.002, %v271_v40  ;;  %v357_v45 = vadd.f32 -0.001, %v294_v39 }
 0x278   :  { %v293_v46 = vadd.f32 %v291_v42, %v273_v43  ;;  %v300_v47 = vsel %vm299_vm12, %v292_v41, %v541_v54 }
 0x279   :  { %v358_v50 = vadd.f32 -0.001, %v295_v44  ;;  %v302_v51 = vsel %vm298_vm13, %v357_v45, %v300_v47 }
 0x27a   :  { %v301_v53 = vsel %vm299_vm12, %v293_v46, %v543_v55 }
 0x27b   :  { %v303_v59 = vsel %vm298_vm13, %v358_v50, %v301_v53 }
 0x2e8   :  { %v323_v21 = vpop.xlane.xlu1 %322 }
 0x2e9   :  { %432 = vrcp.f32 %v323_v21 }
 0x2ec   :  { %v326_v29 = vpop.xlane.xlu1 %325 }
 0x2ed   :  { %434 = vrcp.f32 %v326_v29 }
 0x2f6   :  { %v433_v48 = vpop.eup %432 }
 0x2f7   :  { %v328_v49 = vmul.f32 %v433_v48, %v319_v3 }
 0x2f9   :  { %v331_v56 = vsel %vm251_vm6, %v328_v49, %v302_v51 }
 0x2fa   :  { %v435_v57 = vpop.eup %434  ;;  %333 = vst.msk [vmem:[#allocation2] sm:$0xff] %vm306_vm7, %v331_v56 }
 0x2fb   :  { %v330_v58 = vmul.f32 %v435_v57, %v561_v6 }
 0x2fd   :  { %v332_v54 = vsel %vm251_vm6, %v330_v58, %v303_v59 }
 0x2fe   :  { %334 = vst.msk [vmem:[#allocation2 + $0x8] sm:$0xff] %vm306_vm7, %v332_v54 }
 0x2ff   :  { %447 = shalt.err (!%p444_p4)
}
 0x300   :  { %s459_s23 = smov 128   ;;  %s460_s24 = smov 8  }
 0x301   :  { %346 = dma.vmem_to_hbm [thread:$0]  %s341_s21, 256, %s590_s5, [#allocation3], %s459_s23, %s459_s23, %s460_s24  }
 0x302   :  { %456 = dma.done.wait [#allocation3], 256  }
 0x303   :  { %457 = vsyncadd [#allocation3], 4294967040 }
 0x304   :  { %350 = vsyncpa [#allocation3], 1 }

</bundles_post_ra>
